<compile_context>
chip_gen: v5e
topology: v5e:2x2
jax: 0.10.0
libtpu: 0.0.40
codegen_flags: <defaults>
</compile_context>

<pallas_src>
import jax
import jax.numpy as jnp
from jax import lax
from jax.experimental import pallas as pl
from jax.experimental.pallas import tpu as pltpu

# ----------------------------- config ---------------------------------------
EMB_DIM = 768                 # hard-coded in the PyTorch module (nn.Embedding(vocab, 768))
NUM_CLASSES = 4
VOCAB_SIZE = 50
OUT_CHANNELS = 8
KERNEL_SIZES = (3, 4, 5)
BATCH = 2
SEQ_LEN = 16
NET_DROPOUT = 0.5             # dropout is identity in eval mode
F_PAD = 128                   # lane-dense padded width of the packed conv weight


# ----------------------------- kernel ---------------------------------------
def _make_kernel(kernel_sizes, batch, seq_len, c_out, num_classes, feat_dim,
                 col_base, f_pad):
    """col_base[idx][k] = first packed column of tap k of conv idx (Python ints)."""

    def kernel(emb_ref, w_ref, aux_ref, out_ref):
        B, L = batch, seq_len
        D = emb_ref.shape[-1]

        # ---- conv stage: one MXU matmul covering every (kernel_size, tap) pair.
        emb = emb_ref[...].reshape(B * L, D)                      # (B*L, D)
        p = jnp.dot(emb, w_ref[...],
                    preferred_element_type=jnp.float32)           # (B*L, 128)
        # Conv biases were packed into the tap-0 columns of aux row 0, so a
        # single broadcast add applies each bias exactly once per output pos.
        p = p + aux_ref[0:1, :]
        p = p.reshape(B, L, f_pad)                                # (B, L, 128)

        # ---- per kernel size: shift-and-add taps on the small tile, ReLU, max.
        pooled = []
        for idx, K in enumerate(kernel_sizes):
            l_out = L - K + 1
            c0 = col_base[idx][0]
            acc = p[:, 0:l_out, c0:c0 + c_out]
            for k in range(1, K):
                ck = col_base[idx][k]
                acc = acc + p[:, k:k + l_out, ck:ck + c_out]
            acc = jnp.maximum(acc, 0.0)                           # ReLU
            pooled.append(jnp.max(acc, axis=1))                   # (B, c_out)
        feat = jnp.concatenate(pooled, axis=1)                    # (B, feat_dim)

        # ---- final Linear: too small for the MXU -> VPU mult + lane reduce.
        cols = []
        for c in range(num_classes):
            w_c = aux_ref[1 + c:2 + c, 0:feat_dim]                # (1, feat_dim)
            cols.append(jnp.sum(feat * w_c, axis=1, keepdims=True))  # (B, 1)
        lin_b = aux_ref[1 + num_classes:2 + num_classes, 0:num_classes]
        out_ref[...] = jnp.concatenate(cols, axis=1) + lin_b      # (B, C)

    return kernel


def kimcnn_pallas_forward(emb, w_packed, aux, kernel_sizes, c_out, num_classes,
                          col_base):
    """emb: (B, L, D) f32. w_packed: (D, F_PAD) f32. aux: (rows, 128) f32."""
    B, L, D = emb.shape
    feat_dim = c_out * len(kernel_sizes)
    f_pad = w_packed.shape[1]

    kernel = _make_kernel(kernel_sizes, B, L, c_out, num_classes, feat_dim,
                          col_base, f_pad)
    return pl.pallas_call(
        kernel,
        out_shape=jax.ShapeDtypeStruct((B, num_classes), jnp.float32),
        grid=(1,),                                  # whole batch in one step
        in_specs=[
            pl.BlockSpec((B, L, D), lambda i: (0, 0, 0)),
            pl.BlockSpec((D, f_pad), lambda i: (0, 0)),
            pl.BlockSpec(aux.shape, lambda i: (0, 0)),
        ],
        out_specs=pl.BlockSpec((B, num_classes), lambda i: (0, 0)),
        compiler_params=pltpu.CompilerParams(
            dimension_semantics=("arbitrary",)),
    )(emb, w_packed, aux)


# ----------------------- parameter packing (JAX glue) ------------------------
def pack_params(conv_ws_pt, conv_bs, lin_w, lin_b, kernel_sizes, c_out,
                emb_dim, num_classes, f_pad=F_PAD):
    """Pack all conv taps into one (D, f_pad) matrix, and the conv biases +
    linear weight + linear bias into one small (rows, 128) aux tile."""
    w_packed = jnp.zeros((emb_dim, f_pad), jnp.float32)
    bias_row = jnp.zeros((f_pad,), jnp.float32)
    col_base = []
    col = 0
    for idx, K in enumerate(kernel_sizes):
        bases = []
        for k in range(K):
            # conv weight (C_out, D, K): tap k -> (D, C_out) column block
            w_packed = w_packed.at[:, col:col + c_out].set(conv_ws_pt[idx][:, :, k].T)
            bases.append(col)
            col += c_out
        # fold conv bias into the tap-0 columns (added once per output position)
        bias_row = bias_row.at[bases[0]:bases[0] + c_out].set(conv_bs[idx])
        col_base.append(bases)

    feat_dim = c_out * len(kernel_sizes)
    aux_rows = ((num_classes + 2 + 7) // 8) * 8
    aux = jnp.zeros((aux_rows, 128), jnp.float32)
    aux = aux.at[0, :].set(bias_row)                          # row 0: conv biases
    aux = aux.at[1:1 + num_classes, :feat_dim].set(lin_w)     # rows 1..C: Linear W
    aux = aux.at[1 + num_classes, :num_classes].set(lin_b)    # row C+1: Linear b
    return w_packed, aux, col_base


# -------------------------- plain-JAX reference ------------------------------
def kimcnn_reference(tokens, emb_table, conv_ws_pt, conv_bs, lin_w, lin_b):
    emb = emb_table[tokens]                       # (B, L, D)
    x = jnp.transpose(emb, (0, 2, 1))             # (B, D, L)  == PyTorch NCL
    pooled = []
    for w, b in zip(conv_ws_pt, conv_bs):         # w: (C_out, D, K)
        out = lax.conv_general_dilated(
            x, w, window_strides=(1,), padding="VALID",
            dimension_numbers=("NCH", "OIH", "NCH"),
            precision=lax.Precision.HIGHEST)
        out = jax.nn.relu(out + b[None, :, None])
        pooled.append(jnp.max(out, axis=2))       # max over time
    feat = jnp.concatenate(pooled, axis=1)        # (B, C_out * n_k)
    return jnp.dot(feat, lin_w.T, precision=lax.Precision.HIGHEST) + lin_b


# ------------------------------ main -----------------------------------------
if __name__ == "__main__":
    key = jax.random.PRNGKey(0)
    ks = jax.random.split(key, 4 + 2 * len(KERNEL_SIZES))

    # Parameters (deterministic init; PyTorch-convention shapes).
    emb_table = 0.02 * jax.random.normal(ks[0], (VOCAB_SIZE, EMB_DIM), jnp.float32)
    conv_ws_pt = []   # (C_out, D, K) like nn.Conv1d.weight
    conv_bs = []      # (C_out,)
    for i, K in enumerate(KERNEL_SIZES):
        conv_ws_pt.append(0.05 * jax.random.normal(
            ks[1 + 2 * i], (OUT_CHANNELS, EMB_DIM, K), jnp.float32))
        conv_bs.append(0.01 * jax.random.normal(
            ks[2 + 2 * i], (OUT_CHANNELS,), jnp.float32))
    feat_dim = OUT_CHANNELS * len(KERNEL_SIZES)
    lin_w = 0.05 * jax.random.normal(ks[-3], (NUM_CLASSES, feat_dim), jnp.float32)
    lin_b = 0.01 * jax.random.normal(ks[-2], (NUM_CLASSES,), jnp.float32)

    # Inputs.
    tokens = jax.random.randint(ks[-1], (BATCH, SEQ_LEN), 0, VOCAB_SIZE)
    x_len = jnp.full((BATCH,), SEQ_LEN, jnp.int32)   # unused by forward()
    topic = jnp.zeros((BATCH,), jnp.int32)           # unused by forward()

    # Glue: embedding gather + parameter packing for the kernel.
    emb = emb_table[tokens]                                       # (B, L, D)
    w_packed, aux, col_base = pack_params(
        conv_ws_pt, conv_bs, lin_w, lin_b, KERNEL_SIZES, OUT_CHANNELS,
        EMB_DIM, NUM_CLASSES)

    out = kimcnn_pallas_forward(emb, w_packed, aux, KERNEL_SIZES,
                                OUT_CHANNELS, NUM_CLASSES, col_base)
    out = jax.block_until_ready(out)

    ref = kimcnn_reference(tokens, emb_table, conv_ws_pt, conv_bs, lin_w, lin_b)
    ref = jax.block_until_ready(ref)

    assert out.shape == (BATCH, NUM_CLASSES)
    # Kernel matmul uses default (bf16-pass) MXU precision vs. an f32-HIGHEST
    # reference; observed error is ~1e-4, so 2e-3 gives comfortable margin.
    assert jnp.allclose(out, ref, atol=2e-3, rtol=2e-3), (out, ref)
    print("KERNEL_OK")
</pallas_src>

<mosaic_0001>
module attributes {stable_mosaic.version = 11 : i64} {
  func.func @kernel(%arg0: i32, %arg1: memref<2x16x768xf32, #tpu.memory_space<vmem>>, %arg2: memref<768x128xf32, #tpu.memory_space<vmem>>, %arg3: memref<8x128xf32, #tpu.memory_space<vmem>>, %arg4: memref<2x4xf32, #tpu.memory_space<vmem>>) attributes {dimension_semantics = [#tpu.dimension_semantics<arbitrary>], iteration_bounds = array<i64: 1>, scalar_prefetch = 0 : i64, scratch_operands = 0 : i64, tpu.core_type = #tpu.core_type<tc>, window_params = [{pipeline_mode = #tpu.pipeline_mode<synchronous>, transform_indices = @transform_0, window_bounds = array<i64: 2, 16, 768>}, {pipeline_mode = #tpu.pipeline_mode<synchronous>, transform_indices = @transform_1, window_bounds = array<i64: 768, 128>}, {pipeline_mode = #tpu.pipeline_mode<synchronous>, transform_indices = @transform_2, window_bounds = array<i64: 8, 128>}, {pipeline_mode = #tpu.pipeline_mode<synchronous>, transform_indices = @transform_3, window_bounds = array<i64: 2, 4>}]} {
    %c0 = arith.constant 0 : index
    %c0_0 = arith.constant 0 : index
    %c0_1 = arith.constant 0 : index
    %0 = vector.load %arg1[%c0, %c0_0, %c0_1] : memref<2x16x768xf32, #tpu.memory_space<vmem>>, vector<2x16x768xf32>
    %1 = vector.shape_cast %0 : vector<2x16x768xf32> to vector<32x768xf32>
    %c0_2 = arith.constant 0 : index
    %c0_3 = arith.constant 0 : index
    %2 = vector.load %arg2[%c0_2, %c0_3] : memref<768x128xf32, #tpu.memory_space<vmem>>, vector<768x128xf32>
    %cst = arith.constant dense<0.000000e+00> : vector<32x128xf32>
    %3 = tpu.matmul %1, %2, %cst {dimension_numbers = #tpu.dot_dimension_numbers<[1], [0], [0], [1], [0, 0, 1, 1], [], []>} : vector<32x768xf32>, vector<768x128xf32>, vector<32x128xf32> -> vector<32x128xf32>
    %c0_4 = arith.constant 0 : index
    %c0_5 = arith.constant 0 : index
    %4 = vector.load %arg3[%c0_4, %c0_5] : memref<8x128xf32, #tpu.memory_space<vmem>>, vector<1x128xf32>
    %5 = vector.broadcast %4 : vector<1x128xf32> to vector<32x128xf32>
    %6 = arith.addf %3, %5 : vector<32x128xf32>
    %7 = vector.shape_cast %6 : vector<32x128xf32> to vector<2x16x128xf32>
    %8 = vector.extract_strided_slice %7 {offsets = [0, 0, 0], sizes = [2, 14, 8], strides = [1, 1, 1]} : vector<2x16x128xf32> to vector<2x14x8xf32>
    %9 = vector.extract_strided_slice %7 {offsets = [0, 1, 8], sizes = [2, 14, 8], strides = [1, 1, 1]} : vector<2x16x128xf32> to vector<2x14x8xf32>
    %10 = arith.addf %8, %9 : vector<2x14x8xf32>
    %11 = vector.extract_strided_slice %7 {offsets = [0, 2, 16], sizes = [2, 14, 8], strides = [1, 1, 1]} : vector<2x16x128xf32> to vector<2x14x8xf32>
    %12 = arith.addf %10, %11 : vector<2x14x8xf32>
    %cst_6 = arith.constant 0.000000e+00 : f32
    %13 = vector.broadcast %cst_6 : f32 to vector<2x14x8xf32>
    %14 = arith.maximumf %12, %13 : vector<2x14x8xf32>
    %cst_7 = arith.constant dense<0xFF800000> : vector<2x8xf32>
    %15 = vector.multi_reduction <maximumf>, %14, %cst_7 [1] : vector<2x14x8xf32> to vector<2x8xf32>
    %16 = vector.extract_strided_slice %7 {offsets = [0, 0, 24], sizes = [2, 13, 8], strides = [1, 1, 1]} : vector<2x16x128xf32> to vector<2x13x8xf32>
    %17 = vector.extract_strided_slice %7 {offsets = [0, 1, 32], sizes = [2, 13, 8], strides = [1, 1, 1]} : vector<2x16x128xf32> to vector<2x13x8xf32>
    %18 = arith.addf %16, %17 : vector<2x13x8xf32>
    %19 = vector.extract_strided_slice %7 {offsets = [0, 2, 40], sizes = [2, 13, 8], strides = [1, 1, 1]} : vector<2x16x128xf32> to vector<2x13x8xf32>
    %20 = arith.addf %18, %19 : vector<2x13x8xf32>
    %21 = vector.extract_strided_slice %7 {offsets = [0, 3, 48], sizes = [2, 13, 8], strides = [1, 1, 1]} : vector<2x16x128xf32> to vector<2x13x8xf32>
    %22 = arith.addf %20, %21 : vector<2x13x8xf32>
    %cst_8 = arith.constant 0.000000e+00 : f32
    %23 = vector.broadcast %cst_8 : f32 to vector<2x13x8xf32>
    %24 = arith.maximumf %22, %23 : vector<2x13x8xf32>
    %cst_9 = arith.constant dense<0xFF800000> : vector<2x8xf32>
    %25 = vector.multi_reduction <maximumf>, %24, %cst_9 [1] : vector<2x13x8xf32> to vector<2x8xf32>
    %26 = vector.extract_strided_slice %7 {offsets = [0, 0, 56], sizes = [2, 12, 8], strides = [1, 1, 1]} : vector<2x16x128xf32> to vector<2x12x8xf32>
    %27 = vector.extract_strided_slice %7 {offsets = [0, 1, 64], sizes = [2, 12, 8], strides = [1, 1, 1]} : vector<2x16x128xf32> to vector<2x12x8xf32>
    %28 = arith.addf %26, %27 : vector<2x12x8xf32>
    %29 = vector.extract_strided_slice %7 {offsets = [0, 2, 72], sizes = [2, 12, 8], strides = [1, 1, 1]} : vector<2x16x128xf32> to vector<2x12x8xf32>
    %30 = arith.addf %28, %29 : vector<2x12x8xf32>
    %31 = vector.extract_strided_slice %7 {offsets = [0, 3, 80], sizes = [2, 12, 8], strides = [1, 1, 1]} : vector<2x16x128xf32> to vector<2x12x8xf32>
    %32 = arith.addf %30, %31 : vector<2x12x8xf32>
    %33 = vector.extract_strided_slice %7 {offsets = [0, 4, 88], sizes = [2, 12, 8], strides = [1, 1, 1]} : vector<2x16x128xf32> to vector<2x12x8xf32>
    %34 = arith.addf %32, %33 : vector<2x12x8xf32>
    %cst_10 = arith.constant 0.000000e+00 : f32
    %35 = vector.broadcast %cst_10 : f32 to vector<2x12x8xf32>
    %36 = arith.maximumf %34, %35 : vector<2x12x8xf32>
    %cst_11 = arith.constant dense<0xFF800000> : vector<2x8xf32>
    %37 = vector.multi_reduction <maximumf>, %36, %cst_11 [1] : vector<2x12x8xf32> to vector<2x8xf32>
    %38 = tpu.concatenate %15, %25, %37 in 1 : vector<2x8xf32>, vector<2x8xf32>, vector<2x8xf32> -> vector<2x24xf32>
    %c1 = arith.constant 1 : index
    %c0_12 = arith.constant 0 : index
    %39 = vector.load %arg3[%c1, %c0_12] : memref<8x128xf32, #tpu.memory_space<vmem>>, vector<1x24xf32>
    %40 = vector.broadcast %39 : vector<1x24xf32> to vector<2x24xf32>
    %41 = arith.mulf %38, %40 : vector<2x24xf32>
    %cst_13 = arith.constant dense<0.000000e+00> : vector<2xf32>
    %42 = vector.multi_reduction <add>, %41, %cst_13 [1] : vector<2x24xf32> to vector<2xf32>
    %43 = vector.shape_cast %42 : vector<2xf32> to vector<2x1xf32>
    %c2 = arith.constant 2 : index
    %c0_14 = arith.constant 0 : index
    %44 = vector.load %arg3[%c2, %c0_14] : memref<8x128xf32, #tpu.memory_space<vmem>>, vector<1x24xf32>
    %45 = vector.broadcast %44 : vector<1x24xf32> to vector<2x24xf32>
    %46 = arith.mulf %38, %45 : vector<2x24xf32>
    %cst_15 = arith.constant dense<0.000000e+00> : vector<2xf32>
    %47 = vector.multi_reduction <add>, %46, %cst_15 [1] : vector<2x24xf32> to vector<2xf32>
    %48 = vector.shape_cast %47 : vector<2xf32> to vector<2x1xf32>
    %c3 = arith.constant 3 : index
    %c0_16 = arith.constant 0 : index
    %49 = vector.load %arg3[%c3, %c0_16] : memref<8x128xf32, #tpu.memory_space<vmem>>, vector<1x24xf32>
    %50 = vector.broadcast %49 : vector<1x24xf32> to vector<2x24xf32>
    %51 = arith.mulf %38, %50 : vector<2x24xf32>
    %cst_17 = arith.constant dense<0.000000e+00> : vector<2xf32>
    %52 = vector.multi_reduction <add>, %51, %cst_17 [1] : vector<2x24xf32> to vector<2xf32>
    %53 = vector.shape_cast %52 : vector<2xf32> to vector<2x1xf32>
    %c4 = arith.constant 4 : index
    %c0_18 = arith.constant 0 : index
    %54 = vector.load %arg3[%c4, %c0_18] : memref<8x128xf32, #tpu.memory_space<vmem>>, vector<1x24xf32>
    %55 = vector.broadcast %54 : vector<1x24xf32> to vector<2x24xf32>
    %56 = arith.mulf %38, %55 : vector<2x24xf32>
    %cst_19 = arith.constant dense<0.000000e+00> : vector<2xf32>
    %57 = vector.multi_reduction <add>, %56, %cst_19 [1] : vector<2x24xf32> to vector<2xf32>
    %58 = vector.shape_cast %57 : vector<2xf32> to vector<2x1xf32>
    %c5 = arith.constant 5 : index
    %c0_20 = arith.constant 0 : index
    %59 = vector.load %arg3[%c5, %c0_20] : memref<8x128xf32, #tpu.memory_space<vmem>>, vector<1x4xf32>
    %60 = tpu.concatenate %43, %48, %53, %58 in 1 : vector<2x1xf32>, vector<2x1xf32>, vector<2x1xf32>, vector<2x1xf32> -> vector<2x4xf32>
    %61 = vector.broadcast %59 : vector<1x4xf32> to vector<2x4xf32>
    %62 = arith.addf %60, %61 : vector<2x4xf32>
    %c0_21 = arith.constant 0 : index
    %c0_22 = arith.constant 0 : index
    %63 = vector.load %arg4[%c0_21, %c0_22] : memref<2x4xf32, #tpu.memory_space<vmem>>, vector<2x4xf32>
    tpu.vector_store %arg4[%c0_21, %c0_22], %62 {strides = array<i32>} : memref<2x4xf32, #tpu.memory_space<vmem>>, vector<2x4xf32>,
    return
  }
  func.func @transform_0(%arg0: i32) -> (i32, i32, i32) {
    %c0_i32 = arith.constant 0 : i32
    %c0_i32_0 = arith.constant 0 : i32
    %c0_i32_1 = arith.constant 0 : i32
    %c0_i32_2 = arith.constant 0 : i32
    return %c0_i32, %c0_i32_0, %c0_i32_1 : i32, i32, i32
  }
  func.func @transform_1(%arg0: i32) -> (i32, i32) {
    %c0_i32 = arith.constant 0 : i32
    %c0_i32_0 = arith.constant 0 : i32
    %c0_i32_1 = arith.constant 0 : i32
    return %c0_i32, %c0_i32_0 : i32, i32
  }
  func.func @transform_2(%arg0: i32) -> (i32, i32) {
    %c0_i32 = arith.constant 0 : i32
    %c0_i32_0 = arith.constant 0 : i32
    %c0_i32_1 = arith.constant 0 : i32
    return %c0_i32, %c0_i32_0 : i32, i32
  }
  func.func @transform_3(%arg0: i32) -> (i32, i32) {
    %c0_i32 = arith.constant 0 : i32
    %c0_i32_0 = arith.constant 0 : i32
    %c0_i32_1 = arith.constant 0 : i32
    return %c0_i32, %c0_i32_0 : i32, i32
  }
}

</mosaic_0001>

<bundles_post_ra>
// kernel: tpu_custom_call.1
= control target key start
LH: loop header
LB: loop body
LE: loop exit
PB: predicated region body
PF: predicated region fallthrough
CT: control target
= control target key end

     0   :  { %8 = vsyncpa [#allocation3], 0  ;;  %s850_s0 = inlined_call_operand.hbm [shape: f32[2,16,768], index: 0, kind: input, shape index: {}]   ;;  %s851_s1 = inlined_call_operand.hbm [shape: f32[768,128], index: 1, kind: input, shape index: {}]   ;;  %s852_s2 = inlined_call_operand.hbm [shape: f32[8,128], index: 2, kind: input, shape index: {}]   ;;  %s853_s3 = inlined_call_operand.hbm [shape: f32[2,4], index: 3, kind: output, shape index: {}]  }
   0x1   :  { %9 = vsyncpa [#allocation6], 0  ;;  %s28_s14 = sshll.u32 %s851_s1, 4  ;;  %s29_s14 = int_to_ptr.hbm [resolvable:$true] %s28_s14 }
   0x2   :  { %10 = vsyncpa [#allocation4], 0  ;;  %s751_s15 = smov [#allocation5]   ;;  %s15_s19 = sshll.u32 %s850_s0, 4  ;;  %s16_s19 = int_to_ptr.hbm [resolvable:$true] %s15_s19 }
   0x3   :  { %s30_s16 = sshll.u32 %s751_s15, 4  ;;  %s752_s20 = smov 128   ;;  %s31_s16 = int_to_ptr.vmem [resolvable:$true] %s30_s16 }
   0x4   :  { %s753_s21 = smov 8   ;;  %s754_s22 = smov [#allocation2]  }
   0x5   :  { %36 = dma.hbm_to_vmem [thread:$0]  %s29_s14, 12288, %s31_s16, [#allocation6], %s752_s20, %s752_s20, %s753_s21  }
   0x6   :  { %s17_s23 = sshll.u32 %s754_s22, 4  ;;  %s755_s24 = smov 768   ;;  %s18_s23 = int_to_ptr.vmem [resolvable:$true] %s17_s23 }
   0x7   :  { %s756_s25 = smov 48   ;;  %s42_s27 = sshll.u32 %s852_s2, 4  ;;  %s43_s27 = int_to_ptr.hbm [resolvable:$true] %s42_s27 }
   0x8   :  { %23 = dma.hbm_to_vmem [thread:$0]  %s16_s19, 3072, %s18_s23, [#allocation3], %s755_s24, %s755_s24, %s756_s25  }
   0x9   :  { %s757_s28 = smov [#allocation7]  }
   0xa   :  { %s44_s29 = sshll.u32 %s757_s28, 4  ;;  %s45_s29 = int_to_ptr.vmem [resolvable:$true] %s44_s29 }
   0xb   :  { %47 = dma.hbm_to_vmem [thread:$0]  %s43_s27, 128, %s45_s29, [#allocation6]  }
   0xc   :  { %745 = dma.done.wait [#allocation3], 3072  }
   0xd   :  { %746 = vsyncadd [#allocation3], 4294964224 }
   0xe   :  { %747 = dma.done.wait [#allocation6], 12416  }
   0xf   :  { %748 = vsyncadd [#allocation6], 4294954880  ;;  %v99_v0 = vld [vmem:[#allocation5 + $0x78] sm:$0xff]  ;;  %v98_v2 = vld [vmem:[#allocation5 + $0x70] sm:$0xff]  ;;  %s758_s0 = smov 112   ;;  %s759_s2 = smov 120  }
  0x10   :  { %v131_v1 = vld [vmem:[#allocation5 + $0x178] sm:$0xff]  ;;  %182 = vmatpush.msra.mxu0 %v99_v0  ;;  %v130_v4 = vld [vmem:[#allocation5 + $0x170] sm:$0xff]  ;;  %v97_v6 = vld [vmem:[#allocation5 + $0x68] sm:$0xff]  ;;  %vm383_vm0 = vcmask 1045504   ;;  %s760_s30 = smov 104   ;;  %vm430_vm1 = vcmask 1044480  }
  0x11   :  { %240 = vmatpush.msra.mxu2 %v131_v1  ;;  %v115_v3 = vld [vmem:[#allocation5 + $0xf8] sm:$0xff]  ;;  %v114_v7 = vld [vmem:[#allocation5 + $0xf0] sm:$0xff]  ;;  %v129_v8 = vld [vmem:[#allocation5 + $0x168] sm:$0xff]  ;;  %vm360_vm2 = vcmask 1046528   ;;  %vm477_vm3 = vcmask 1043456   ;;  %s761_s4 = smov 96  }
  0x12   :  { %v147_v5 = vld [vmem:[#allocation5 + $0x1f8] sm:$0xff]  ;;  %211 = vmatpush.msra.mxu1 %v115_v3  ;;  %183 = vmatpush.msra.mxu0 %v98_v2  ;;  %v146_v9 = vld [vmem:[#allocation5 + $0x1f0] sm:$0xff]  ;;  %v113_v10 = vld [vmem:[#allocation5 + $0xe8] sm:$0xff]  ;;  %vm412_vm4 = vcmask 62464   ;;  %vm410_vm5 = vcmask 64512   ;;  %vm457_vm6 = vcmask 261312  }
  0x13   :  { %269 = vmatpush.msra.mxu3 %v147_v5  ;;  %241 = vmatpush.msra.mxu2 %v130_v4  ;;  %v96_v11 = vld [vmem:[#allocation5 + $0x60] sm:$0xff]  ;;  %v145_v13 = vld [vmem:[#allocation5 + $0x1e8] sm:$0xff]  ;;  %v95_v16 = vld [vmem:[#allocation5 + $0x58] sm:$0xff]  ;;  %vm459_vm7 = vcmask 258240   ;;  %vm504_vm8 = vcmask 523712   ;;  %vm506_vm9 = vcmask 519616  }
  0x14   :  { %212 = vmatpush.msra.mxu1 %v114_v7  ;;  %v128_v12 = vld [vmem:[#allocation5 + $0x160] sm:$0xff]  ;;  %184 = vmatpush.msra.mxu0 %v97_v6  ;;  %v127_v17 = vld [vmem:[#allocation5 + $0x158] sm:$0xff]  ;;  %v94_v20 = vld [vmem:[#allocation5 + $0x50] sm:$0xff]  ;;  %vm526_vm10 = vcmask 1041409   ;;  %s762_s5 = smov 88   ;;  %vm542_vm11 = vcmask 130048  }
  0x15   :  { %270 = vmatpush.msra.mxu3 %v146_v9  ;;  %242 = vmatpush.msra.mxu2 %v129_v8  ;;  %v112_v14 = vld [vmem:[#allocation5 + $0xe0] sm:$0xff]  ;;  %v111_v18 = vld [vmem:[#allocation5 + $0xd8] sm:$0xff]  ;;  %v126_v21 = vld [vmem:[#allocation5 + $0x150] sm:$0xff]  ;;  %vm547_vm12 = vcmask 189440   ;;  %vm570_vm13 = vcmask 7168   ;;  %vm572_vm14 = vcmask 15360  }
  0x16   :  { %v144_v15 = vld [vmem:[#allocation5 + $0x1e0] sm:$0xff]  ;;  %213 = vmatpush.msra.mxu1 %v113_v10  ;;  %185 = vmatpush.msra.mxu0 %v96_v11  ;;  %v143_v19 = vld [vmem:[#allocation5 + $0x1d8] sm:$0xff]  ;;  %v110_v22 = vld [vmem:[#allocation5 + $0xd0] sm:$0xff]  ;;  %vm574_vm15 = vcmask 23552   ;;  %s763_s6 = smov [#allocation8]   ;;  %s587_s10 = sshll.u32 %s853_s3, 4  ;;  %s588_s10 = int_to_ptr.hbm [resolvable:$true] %s587_s10 }
  0x17   :  { %271 = vmatpush.msra.mxu3 %v145_v13  ;;  %243 = vmatpush.msra.mxu2 %v128_v12  ;;  %v142_v23 = vld [vmem:[#allocation5 + $0x1d0] sm:$0xff]  ;;  %v93_v24 = vld [vmem:[#allocation5 + $0x48] sm:$0xff]  ;;  %v92_v28 = vld [vmem:[#allocation5 + $0x40] sm:$0xff]  ;;  %s585_s7 = sshll.u32 %s763_s6, 4  ;;  %s586_s7 = int_to_ptr.vmem [resolvable:$true] %s585_s7 }
  0x18   :  { %214 = vmatpush.msra.mxu1 %v112_v14  ;;  %186 = vmatpush.msra.mxu0 %v95_v16  ;;  %v125_v25 = vld [vmem:[#allocation5 + $0x148] sm:$0xff]  ;;  %v124_v29 = vld [vmem:[#allocation5 + $0x140] sm:$0xff]  ;;  %v91_v32 = vld [vmem:[#allocation5 + $0x38] sm:$0xff] }
  0x19   :  { %272 = vmatpush.msra.mxu3 %v144_v15  ;;  %244 = vmatpush.msra.mxu2 %v127_v17  ;;  %v109_v26 = vld [vmem:[#allocation5 + $0xc8] sm:$0xff]  ;;  %v108_v30 = vld [vmem:[#allocation5 + $0xc0] sm:$0xff]  ;;  %v123_v33 = vld [vmem:[#allocation5 + $0x138] sm:$0xff] }
  0x1a   :  { %215 = vmatpush.msra.mxu1 %v111_v18  ;;  %187 = vmatpush.msra.mxu0 %v94_v20  ;;  %v141_v27 = vld [vmem:[#allocation5 + $0x1c8] sm:$0xff]  ;;  %v140_v31 = vld [vmem:[#allocation5 + $0x1c0] sm:$0xff]  ;;  %v107_v34 = vld [vmem:[#allocation5 + $0xb8] sm:$0xff] }
  0x1b   :  { %273 = vmatpush.msra.mxu3 %v143_v19  ;;  %245 = vmatpush.msra.mxu2 %v126_v21  ;;  %v139_v35 = vld [vmem:[#allocation5 + $0x1b8] sm:$0xff]  ;;  %v90_v36 = vld [vmem:[#allocation5 + $0x30] sm:$0xff]  ;;  %v89_v40 = vld [vmem:[#allocation5 + $0x28] sm:$0xff] }
  0x1c   :  { %216 = vmatpush.msra.mxu1 %v110_v22  ;;  %188 = vmatpush.msra.mxu0 %v93_v24  ;;  %v122_v37 = vld [vmem:[#allocation5 + $0x130] sm:$0xff]  ;;  %v121_v41 = vld [vmem:[#allocation5 + $0x128] sm:$0xff]  ;;  %v88_v44 = vld [vmem:[#allocation5 + $0x20] sm:$0xff] }
  0x1d   :  { %274 = vmatpush.msra.mxu3 %v142_v23  ;;  %246 = vmatpush.msra.mxu2 %v125_v25  ;;  %v106_v38 = vld [vmem:[#allocation5 + $0xb0] sm:$0xff]  ;;  %v105_v42 = vld [vmem:[#allocation5 + $0xa8] sm:$0xff]  ;;  %v120_v45 = vld [vmem:[#allocation5 + $0x120] sm:$0xff] }
  0x1e   :  { %217 = vmatpush.msra.mxu1 %v109_v26  ;;  %189 = vmatpush.msra.mxu0 %v92_v28  ;;  %v138_v39 = vld [vmem:[#allocation5 + $0x1b0] sm:$0xff]  ;;  %v137_v43 = vld [vmem:[#allocation5 + $0x1a8] sm:$0xff]  ;;  %v104_v46 = vld [vmem:[#allocation5 + $0xa0] sm:$0xff] }
  0x1f   :  { %275 = vmatpush.msra.mxu3 %v141_v27  ;;  %247 = vmatpush.msra.mxu2 %v124_v29  ;;  %v136_v47 = vld [vmem:[#allocation5 + $0x1a0] sm:$0xff]  ;;  %v87_v48 = vld [vmem:[#allocation5 + $0x18] sm:$0xff]  ;;  %v86_v52 = vld [vmem:[#allocation5 + $0x10] sm:$0xff] }
  0x20   :  { %218 = vmatpush.msra.mxu1 %v108_v30  ;;  %190 = vmatpush.msra.mxu0 %v91_v32  ;;  %v119_v49 = vld [vmem:[#allocation5 + $0x118] sm:$0xff]  ;;  %v118_v53 = vld [vmem:[#allocation5 + $0x110] sm:$0xff]  ;;  %v85_v56 = vld [vmem:[#allocation5 + $0x8] sm:$0xff] }
  0x21   :  { %276 = vmatpush.msra.mxu3 %v140_v31  ;;  %248 = vmatpush.msra.mxu2 %v123_v33  ;;  %v103_v50 = vld [vmem:[#allocation5 + $0x98] sm:$0xff]  ;;  %v102_v54 = vld [vmem:[#allocation5 + $0x90] sm:$0xff]  ;;  %v117_v57 = vld [vmem:[#allocation5 + $0x108] sm:$0xff] }
  0x22   :  { %219 = vmatpush.msra.mxu1 %v107_v34  ;;  %191 = vmatpush.msra.mxu0 %v90_v36  ;;  %v135_v51 = vld [vmem:[#allocation5 + $0x198] sm:$0xff]  ;;  %v134_v55 = vld [vmem:[#allocation5 + $0x190] sm:$0xff]  ;;  %v101_v58 = vld [vmem:[#allocation5 + $0x88] sm:$0xff] }
  0x23   :  { %277 = vmatpush.msra.mxu3 %v139_v35  ;;  %249 = vmatpush.msra.mxu2 %v122_v37  ;;  %v133_v59 = vld [vmem:[#allocation5 + $0x188] sm:$0xff]  ;;  %v84_v60 = vld [vmem:[#allocation5] sm:$0xff]  ;;  %v62_v63 = vld [vmem:[#allocation2 + $0x10] sm:$0xff] }
  0x24   :  { %220 = vmatpush.msra.mxu1 %v106_v38  ;;  %192 = vmatpush.msra.mxu0 %v89_v40  ;;  %v116_v61 = vld [vmem:[#allocation5 + $0x100] sm:$0xff]  ;;  %v163_v0 = vld [vmem:[#allocation5 + $0x278] sm:$0xff]  ;;  %v61_v3 = vld [vmem:[#allocation2 + $0x8] sm:$0xff] }
  0x25   :  { %278 = vmatpush.msra.mxu3 %v138_v39  ;;  %250 = vmatpush.msra.mxu2 %v121_v41  ;;  %v60_v62 = vld [vmem:[#allocation2] sm:$0xff]  ;;  %v63_v4 = vld [vmem:[#allocation2 + $0x18] sm:$0xff]  ;;  %v162_v5 = vld [vmem:[#allocation5 + $0x270] sm:$0xff] }
  0x26   :  { %221 = vmatpush.msra.mxu1 %v105_v42  ;;  %193 = vmatpush.msra.mxu0 %v88_v44  ;;  %v100_v1 = vld [vmem:[#allocation5 + $0x80] sm:$0xff]  ;;  %v179_v6 = vld [vmem:[#allocation5 + $0x2f8] sm:$0xff]  ;;  %v161_v7 = vld [vmem:[#allocation5 + $0x268] sm:$0xff] }
  0x27   :  { %279 = vmatpush.msra.mxu3 %v137_v43  ;;  %251 = vmatpush.msra.mxu2 %v120_v45  ;;  %v132_v2 = vld [vmem:[#allocation5 + $0x180] sm:$0xff]  ;;  %v178_v8 = vld [vmem:[#allocation5 + $0x2f0] sm:$0xff]  ;;  %v177_v10 = vld [vmem:[#allocation5 + $0x2e8] sm:$0xff] }
  0x28   :  { %222 = vmatpush.msra.mxu1 %v104_v46  ;;  %194 = vmatpush.msra.mxu0 %v87_v48  ;;  %v160_v9 = vld [vmem:[#allocation5 + $0x260] sm:$0xff]  ;;  %v66_v11 = vld [vmem:[#allocation2 + $0x30] sm:$0xff]  ;;  %v159_v13 = vld [vmem:[#allocation5 + $0x258] sm:$0xff] }
  0x29   :  { %280 = vmatpush.msra.mxu3 %v136_v47  ;;  %252 = vmatpush.msra.mxu2 %v119_v49  ;;  %v68_v12 = vld [vmem:[#allocation2 + $0x40] sm:$0xff]  ;;  %v67_v15 = vld [vmem:[#allocation2 + $0x38] sm:$0xff]  ;;  %v69_v16 = vld [vmem:[#allocation2 + $0x48] sm:$0xff] }
  0x2a   :  { %223 = vmatpush.msra.mxu1 %v103_v50  ;;  %195 = vmatpush.msra.mxu0 %v86_v52  ;;  %v176_v14 = vld [vmem:[#allocation5 + $0x2e0] sm:$0xff]  ;;  %v158_v17 = vld [vmem:[#allocation5 + $0x250] sm:$0xff]  ;;  %v175_v18 = vld [vmem:[#allocation5 + $0x2d8] sm:$0xff] }
  0x2b   :  { %281 = vmatpush.msra.mxu3 %v135_v51  ;;  %253 = vmatpush.msra.mxu2 %v118_v53  ;;  %v157_v19 = vld [vmem:[#allocation5 + $0x248] sm:$0xff]  ;;  %v174_v20 = vld [vmem:[#allocation5 + $0x2d0] sm:$0xff]  ;;  %v156_v21 = vld [vmem:[#allocation5 + $0x240] sm:$0xff] }
  0x2c   :  { %224 = vmatpush.msra.mxu1 %v102_v54  ;;  %196 = vmatpush.msra.mxu0 %v85_v56  ;;  %v173_v22 = vld [vmem:[#allocation5 + $0x2c8] sm:$0xff]  ;;  %v72_v23 = vld [vmem:[#allocation2 + $0x60] sm:$0xff]  ;;  %v74_v24 = vld [vmem:[#allocation2 + $0x70] sm:$0xff] }
  0x2d   :  { %282 = vmatpush.msra.mxu3 %v134_v55  ;;  %254 = vmatpush.msra.mxu2 %v117_v57  ;;  %v155_v25 = vld [vmem:[#allocation5 + $0x238] sm:$0xff]  ;;  %v172_v26 = vld [vmem:[#allocation5 + $0x2c0] sm:$0xff]  ;;  %v73_v27 = vld [vmem:[#allocation2 + $0x68] sm:$0xff] }
  0x2e   :  { %225 = vmatpush.msra.mxu1 %v101_v58  ;;  %197 = vmatpush.msra.mxu0 %v84_v60  ;;  %v75_v28 = vld [vmem:[#allocation2 + $0x78] sm:$0xff]  ;;  %v154_v29 = vld [vmem:[#allocation5 + $0x230] sm:$0xff]  ;;  %v153_v31 = vld [vmem:[#allocation5 + $0x228] sm:$0xff] }
  0x2f   :  { %283 = vmatpush.msra.mxu3 %v133_v59  ;;  %255 = vmatpush.msra.mxu2 %v116_v61  ;;  %v171_v30 = vld [vmem:[#allocation5 + $0x2b8] sm:$0xff]  ;;  %v170_v32 = vld [vmem:[#allocation5 + $0x2b0] sm:$0xff]  ;;  %v152_v33 = vld [vmem:[#allocation5 + $0x220] sm:$0xff] }
  0x30   :  { %198 = vmatmul.f32.vlgmr.msra.gmra.mxu0 %v60_v62  ;;  %256 = vmatmul.f32.vlgmr.msra.gmra.mxu2 %v62_v63  ;;  %v169_v34 = vld [vmem:[#allocation5 + $0x2a8] sm:$0xff]  ;;  %v78_v35 = vld [vmem:[#allocation2 + $0x90] sm:$0xff]  ;;  %v80_v36 = vld [vmem:[#allocation2 + $0xa0] sm:$0xff] }
  0x31   :  { %298 = vmatpush.msrb.mxu0 %v163_v0  ;;  %226 = vmatpush.msra.mxu1 %v100_v1  ;;  %v151_v37 = vld [vmem:[#allocation5 + $0x218] sm:$0xff]  ;;  %v168_v38 = vld [vmem:[#allocation5 + $0x2a0] sm:$0xff]  ;;  %v81_v40 = vld [vmem:[#allocation2 + $0xa8] sm:$0xff] }
  0x32   :  { %284 = vmatpush.msra.mxu3 %v132_v2  ;;  %598 = vmatpush.msrb.mxu2 %v163_v0  ;;  %v79_v39 = vld [vmem:[#allocation2 + $0x98] sm:$0xff]  ;;  %v150_v41 = vld [vmem:[#allocation5 + $0x210] sm:$0xff]  ;;  %v149_v43 = vld [vmem:[#allocation5 + $0x208] sm:$0xff] }
  0x33   :  { %227 = vmatmul.f32.vlgmr.msra.gmra.mxu1 %v61_v3  ;;  %285 = vmatmul.f32.vlgmr.msra.gmra.mxu3 %v63_v4  ;;  %v167_v42 = vld [vmem:[#allocation5 + $0x298] sm:$0xff]  ;;  %v166_v44 = vld [vmem:[#allocation5 + $0x290] sm:$0xff]  ;;  %v148_v45 = vld [vmem:[#allocation5 + $0x200] sm:$0xff] }
  0x34   :  { %299 = vmatpush.msrb.mxu0 %v162_v5  ;;  %327 = vmatpush.msrb.mxu1 %v179_v6  ;;  %v165_v46 = vld [vmem:[#allocation5 + $0x288] sm:$0xff]  ;;  %v64_v47 = vld [vmem:[#allocation2 + $0x20] sm:$0xff]  ;;  %v70_v52 = vld [vmem:[#allocation2 + $0x50] sm:$0xff] }
  0x35   :  { %599 = vmatpush.msrb.mxu2 %v162_v5  ;;  %614 = vmatpush.msrb.mxu3 %v179_v6  ;;  %v76_v48 = vld [vmem:[#allocation2 + $0x80] sm:$0xff]  ;;  %v65_v50 = vld [vmem:[#allocation2 + $0x28] sm:$0xff]  ;;  %v82_v53 = vld [vmem:[#allocation2 + $0xb0] sm:$0xff] }
  0x36   :  { %300 = vmatpush.msrb.mxu0 %v161_v7  ;;  %328 = vmatpush.msrb.mxu1 %v178_v8  ;;  %v164_v49 = vld [vmem:[#allocation5 + $0x280] sm:$0xff]  ;;  %v77_v51 = vld [vmem:[#allocation2 + $0x88] sm:$0xff]  ;;  %v71_v54 = vld [vmem:[#allocation2 + $0x58] sm:$0xff] }
  0x37   :  { %600 = vmatpush.msrb.mxu2 %v161_v7  ;;  %615 = vmatpush.msrb.mxu3 %v178_v8  ;;  %v83_v55 = vld [vmem:[#allocation2 + $0xb8] sm:$0xff]  ;;  %v643_v6 = vld [vmem:[#allocation7] ss:$0 sm:$0xff] }
  0x38   :  { %301 = vmatpush.msrb.mxu0 %v160_v9  ;;  %329 = vmatpush.msrb.mxu1 %v177_v10 }
  0x39   :  { %601 = vmatpush.msrb.mxu2 %v160_v9  ;;  %616 = vmatpush.msrb.mxu3 %v177_v10 }
  0x3a   :  { %201 = vmatmul.f32.gmra.mxu0 %v66_v11  ;;  %259 = vmatmul.f32.gmra.mxu2 %v68_v12 }
  0x3b   :  { %302 = vmatpush.msrb.mxu0 %v159_v13  ;;  %330 = vmatpush.msrb.mxu1 %v176_v14 }
  0x3c   :  { %602 = vmatpush.msrb.mxu2 %v159_v13  ;;  %617 = vmatpush.msrb.mxu3 %v176_v14 }
  0x3d   :  { %230 = vmatmul.f32.gmra.mxu1 %v67_v15  ;;  %288 = vmatmul.f32.gmra.mxu3 %v69_v16 }
  0x3e   :  { %303 = vmatpush.msrb.mxu0 %v158_v17  ;;  %331 = vmatpush.msrb.mxu1 %v175_v18 }
  0x3f   :  { %603 = vmatpush.msrb.mxu2 %v158_v17  ;;  %618 = vmatpush.msrb.mxu3 %v175_v18 }
  0x40   :  { %304 = vmatpush.msrb.mxu0 %v157_v19  ;;  %332 = vmatpush.msrb.mxu1 %v174_v20 }
  0x41   :  { %604 = vmatpush.msrb.mxu2 %v157_v19  ;;  %619 = vmatpush.msrb.mxu3 %v174_v20 }
  0x42   :  { %305 = vmatpush.msrb.mxu0 %v156_v21  ;;  %333 = vmatpush.msrb.mxu1 %v173_v22 }
  0x43   :  { %605 = vmatpush.msrb.mxu2 %v156_v21  ;;  %620 = vmatpush.msrb.mxu3 %v173_v22 }
  0x44   :  { %204 = vmatmul.f32.gmra.mxu0 %v72_v23  ;;  %262 = vmatmul.f32.gmra.mxu2 %v74_v24 }
  0x45   :  { %306 = vmatpush.msrb.mxu0 %v155_v25  ;;  %334 = vmatpush.msrb.mxu1 %v172_v26 }
  0x46   :  { %606 = vmatpush.msrb.mxu2 %v155_v25  ;;  %621 = vmatpush.msrb.mxu3 %v172_v26 }
  0x47   :  { %233 = vmatmul.f32.gmra.mxu1 %v73_v27  ;;  %291 = vmatmul.f32.gmra.mxu3 %v75_v28 }
  0x48   :  { %307 = vmatpush.msrb.mxu0 %v154_v29  ;;  %335 = vmatpush.msrb.mxu1 %v171_v30 }
  0x49   :  { %607 = vmatpush.msrb.mxu2 %v154_v29  ;;  %622 = vmatpush.msrb.mxu3 %v171_v30 }
  0x4a   :  { %308 = vmatpush.msrb.mxu0 %v153_v31  ;;  %336 = vmatpush.msrb.mxu1 %v170_v32 }
  0x4b   :  { %608 = vmatpush.msrb.mxu2 %v153_v31  ;;  %623 = vmatpush.msrb.mxu3 %v170_v32 }
  0x4c   :  { %309 = vmatpush.msrb.mxu0 %v152_v33  ;;  %337 = vmatpush.msrb.mxu1 %v169_v34 }
  0x4d   :  { %609 = vmatpush.msrb.mxu2 %v152_v33  ;;  %624 = vmatpush.msrb.mxu3 %v169_v34 }
  0x4e   :  { %207 = vmatmul.f32.gmra.mxu0 %v78_v35  ;;  %265 = vmatmul.f32.gmra.mxu2 %v80_v36 }
  0x4f   :  { %310 = vmatpush.msrb.mxu0 %v151_v37  ;;  %338 = vmatpush.msrb.mxu1 %v168_v38 }
  0x50   :  { %610 = vmatpush.msrb.mxu2 %v151_v37  ;;  %625 = vmatpush.msrb.mxu3 %v168_v38 }
  0x51   :  { %236 = vmatmul.f32.gmra.mxu1 %v79_v39  ;;  %294 = vmatmul.f32.gmra.mxu3 %v81_v40 }
  0x52   :  { %311 = vmatpush.msrb.mxu0 %v150_v41  ;;  %339 = vmatpush.msrb.mxu1 %v167_v42 }
  0x53   :  { %611 = vmatpush.msrb.mxu2 %v150_v41  ;;  %626 = vmatpush.msrb.mxu3 %v167_v42 }
  0x54   :  { %312 = vmatpush.msrb.mxu0 %v149_v43  ;;  %340 = vmatpush.msrb.mxu1 %v166_v44 }
  0x55   :  { %612 = vmatpush.msrb.mxu2 %v149_v43  ;;  %627 = vmatpush.msrb.mxu3 %v166_v44 }
  0x56   :  { %313 = vmatpush.msrb.mxu0 %v148_v45  ;;  %341 = vmatpush.msrb.mxu1 %v165_v46 }
  0x57   :  { %613 = vmatpush.msrb.mxu2 %v148_v45  ;;  %628 = vmatpush.msrb.mxu3 %v165_v46 }
  0x58   :  { %314 = vmatmul.f32.vlgmr.msrb.gmra.mxu0 %v64_v47  ;;  %320 = vmatmul.f32.vlgmr.msrb.gmra.mxu2 %v76_v48 }
  0x59   :  { %342 = vmatpush.msrb.mxu1 %v164_v49  ;;  %629 = vmatpush.msrb.mxu3 %v164_v49 }
  0x5a   :  { %343 = vmatmul.f32.vlgmr.msrb.gmra.mxu1 %v65_v50  ;;  %349 = vmatmul.f32.vlgmr.msrb.gmra.mxu3 %v77_v51 }
  0x60   :  { %317 = vmatmul.f32.gmra.mxu0 %v70_v52  ;;  %323 = vmatmul.f32.gmra.mxu2 %v82_v53 }
  0x62   :  { %346 = vmatmul.f32.gmra.mxu1 %v71_v54  ;;  %352 = vmatmul.f32.gmra.mxu3 %v83_v55 }
  0xad   :  { %v199_v56 = vpop.f32.mrf.mxu0 }
  0xae   :  { %v200_v10 = vadd.f32 %v643_v6, %v199_v56 }
  0xb0   :  { %v228_v57 = vpop.f32.mrf.mxu1 }
  0xb1   :  { %v229_v16 = vadd.f32 %v228_v57, %v200_v10 }
  0xb3   :  { %v257_v58 = vpop.f32.mrf.mxu2 }
  0xb4   :  { %v258_v17 = vadd.f32 %v257_v58, %v229_v16 }
  0xb6   :  { %v286_v59 = vpop.f32.mrf.mxu3 }
  0xb7   :  { %v202_v60 = vpop.f32.mrf.mxu0  ;;  %v287_v25 = vadd.f32 %v286_v59, %v258_v17 }
  0xb8   :  { %v203_v8 = vadd.f32 %v643_v6, %v202_v60 }
  0xba   :  { %v231_v61 = vpop.f32.mrf.mxu1 }
  0xbb   :  { %v232_v12 = vadd.f32 %v231_v61, %v203_v8 }
  0xbd   :  { %v260_v62 = vpop.f32.mrf.mxu2 }
  0xbe   :  { %v261_v14 = vadd.f32 %v260_v62, %v232_v12 }
  0xc0   :  { %v289_v63 = vpop.f32.mrf.mxu3 }
  0xc1   :  { %v205_v0 = vpop.f32.mrf.mxu0  ;;  %v290_v19 = vadd.f32 %v289_v63, %v261_v14 }
  0xc2   :  { %v206_v32 = vadd.f32 %v643_v6, %v205_v0 }
  0xc4   :  { %v234_v1 = vpop.f32.mrf.mxu1 }
  0xc5   :  { %v235_v38 = vadd.f32 %v234_v1, %v206_v32 }
  0xc7   :  { %v263_v2 = vpop.f32.mrf.mxu2 }
  0xc8   :  { %v264_v40 = vadd.f32 %v263_v2, %v235_v38 }
  0xca   :  { %v292_v3 = vpop.f32.mrf.mxu3 }
  0xcb   :  { %v208_v4 = vpop.f32.mrf.mxu0  ;;  %v293_v44 = vadd.f32 %v292_v3, %v264_v40 }
  0xcc   :  { %v209_v15 = vadd.f32 %v643_v6, %v208_v4 }
  0xce   :  { %v237_v5 = vpop.f32.mrf.mxu1 }
  0xcf   :  { %v238_v20 = vadd.f32 %v237_v5, %v209_v15 }
  0xd1   :  { %v266_v7 = vpop.f32.mrf.mxu2 }
  0xd2   :  { %v267_v23 = vadd.f32 %v266_v7, %v238_v20 }
  0xd4   :  { %v295_v9 = vpop.f32.mrf.mxu3 }
  0xd5   :  { %v315_v11 = vpop.f32.mrf.mxu0  ;;  %v296_v29 = vadd.f32 %v295_v9, %v267_v23 }
  0xd6   :  { %v316_v28 = vadd.f32 %v315_v11, %v287_v25 }
  0xd7   :  { %v344_v13 = vpop.f32.mrf.mxu1 }
  0xd8   :  { %v345_v35 = vadd.f32 %v344_v13, %v316_v28 }
  0xda   :  { %v384_v41 = vrot.slane %v345_v35, 2  ;;  %v431_v47 = vrot.slane %v345_v35, 3  ;;  %v361_v48 = vrot.slane %v345_v35, 1  ;;  %v478_v55 = vrot.slane %v345_v35, 4 }
  0xdb   :  { %v321_v18 = vpop.f32.mrf.mxu2 }
  0xdc   :  { %v322_v45 = vadd.f32 %v321_v18, %v293_v44 }
  0xdd   :  { %v318_v21 = vpop.f32.mrf.mxu0  ;;  %v350_v22 = vpop.f32.mrf.mxu3 }
  0xde   :  { %v319_v24 = vadd.f32 %v318_v21, %v290_v19  ;;  %v809_v49 = vadd.f32 %v350_v22, %v322_v45 }
  0xdf   :  { %v347_v26 = vpop.f32.mrf.mxu1 }
  0xe0   :  { %v793_v27 = vadd.f32 %v347_v26, %v319_v24  ;;  %v364_v52 = vrot.slane %v809_v49, 1  ;;  %v434_v58 = vrot.slane %v809_v49, 3  ;;  %v481_v61 = vrot.slane %v809_v49, 4 }
  0xe1   :  { %v387_v62 = vrot.slane %v809_v49, 2 }
  0xe2   :  { %v385_v30 = vrot.slane %v793_v27, 2  ;;  %v362_v31 = vrot.slane %v793_v27, 1  ;;  %v432_v42 = vrot.slane %v793_v27, 3  ;;  %v479_v53 = vrot.slane %v793_v27, 4 }
  0xe3   :  { %v324_v33 = vpop.f32.mrf.mxu2 }
  0xe4   :  { %v325_v34 = vadd.f32 %v324_v33, %v296_v29  ;;  %392 = vrot.lane.b32.xlu2 %v385_v30, %s758_s0  ;;  %369 = vrot.lane.b32.xlu0 %v362_v31, %s759_s2  ;;  %v386_v43 = vsel %vm383_vm0, %v384_v41, %v385_v30  ;;  %v433_v50 = vsel %vm430_vm1, %v431_v47, %v432_v42 }
  0xe5   :  { %v353_v36 = vpop.f32.mrf.mxu3  ;;  %v363_v51 = vsel %vm360_vm2, %v361_v48, %v362_v31  ;;  %v480_v57 = vsel %vm477_vm3, %v478_v55, %v479_v53 }
  0xe6   :  { %v799_v37 = vadd.f32 %v353_v36, %v325_v34 }
  0xe8   :  { %v365_v39 = vrot.slane %v799_v37, 1  ;;  %v388_v46 = vrot.slane %v799_v37, 2  ;;  %v435_v56 = vrot.slane %v799_v37, 3  ;;  %v482_v59 = vrot.slane %v799_v37, 4 }
  0xea   :  { %373 = vrot.lane.b32.xlu1 %v365_v39, %s759_s2  ;;  %v366_v54 = vsel %vm360_vm2, %v364_v52, %v365_v39  ;;  %v436_v60 = vsel %vm430_vm1, %v434_v58, %v435_v56  ;;  %v483_v63 = vsel %vm477_vm3, %v481_v61, %v482_v59  ;;  %v389_v0 = vsel %vm383_vm0, %v387_v62, %v388_v46 }
  0xeb   :  { %vm578_vm0 = vcmask 25600  }
  0xec   :  { %439 = vrot.lane.b32.xlu0 %v432_v42, %s760_s30  ;;  %390 = vrot.lane.b32.xlu2 %v386_v43, %s758_s0 }
  0xf2   :  { %396 = vrot.lane.b32.xlu1 %v388_v46, %s758_s0 }
  0xf4   :  { %437 = vrot.lane.b32.xlu2 %v433_v50, %s760_s30  ;;  %367 = vrot.lane.b32.xlu0 %v363_v51, %s759_s2 }
  0xfa   :  { %371 = vrot.lane.b32.xlu1 %v366_v54, %s759_s2 }
  0xfc   :  { %443 = vrot.lane.b32.xlu2 %v435_v56, %s760_s30  ;;  %484 = vrot.lane.b32.xlu0 %v480_v57, %s761_s4 }
 0x102   :  { %441 = vrot.lane.b32.xlu1 %v436_v60, %s760_s30 }
 0x104   :  { %488 = vrot.lane.b32.xlu2 %v483_v63, %s761_s4  ;;  %394 = vrot.lane.b32.xlu0 %v389_v0, %s758_s0 }
 0x10a   :  { %486 = vrot.lane.b32.xlu1 %v479_v53, %s761_s4 }
 0x10c   :  { %490 = vrot.lane.b32.xlu0 %v482_v59, %s761_s4 }
 0x13e   :  { %v393_v1 = vpop.permute.xlu2 %392 }
 0x146   :  { %v391_v3 = vpop.permute.xlu2 %390 }
 0x14e   :  { %v438_v9 = vpop.permute.xlu2 %437 }
 0x156   :  { %v370_v2 = vpop.permute.xlu0 %369  ;;  %v444_v26 = vpop.permute.xlu2 %443 }
 0x157   :  { %v380_v6 = vadd.f32 %v370_v2, %v793_v27 }
 0x159   :  { %v403_v8 = vadd.f32 %v393_v1, %v380_v6 }
 0x15b   :  { %v407_v13 = vmax.f32 %v403_v8, 0.0 }
 0x15c   :  { %v374_v4 = vpop.permute.xlu1 %373 }
 0x15d   :  { %v413_v19 = vsel %vm412_vm4, %v407_v13, -inf  ;;  %v382_v22 = vadd.f32 %v374_v4, %v799_v37 }
 0x15e   :  { %v440_v5 = vpop.permute.xlu0 %439  ;;  %v489_v44 = vpop.permute.xlu2 %488 }
 0x15f   :  { %v450_v12 = vadd.f32 %v440_v5, %v403_v8 }
 0x161   :  { %v454_v17 = vmax.f32 %v450_v12, 0.0 }
 0x163   :  { %v460_v27 = vsel %vm459_vm7, %v454_v17, -inf }
 0x164   :  { %v397_v7 = vpop.permute.xlu1 %396 }
 0x165   :  { %v405_v28 = vadd.f32 %v397_v7, %v382_v22 }
 0x166   :  { %v368_v10 = vpop.permute.xlu0 %367 }
 0x167   :  { %v379_v11 = vadd.f32 %v368_v10, %v345_v35  ;;  %v452_v32 = vadd.f32 %v444_v26, %v405_v28  ;;  %v409_v35 = vmax.f32 %v405_v28, 0.0 }
 0x169   :  { %v402_v14 = vadd.f32 %v391_v3, %v379_v11  ;;  %v456_v37 = vmax.f32 %v452_v32, 0.0  ;;  %v422_v45 = vsel %vm412_vm4, %v409_v35, -inf }
 0x16b   :  { %v406_v15 = vmax.f32 %v402_v14, 0.0  ;;  %v449_v16 = vadd.f32 %v438_v9, %v402_v14 }
 0x16c   :  { %v372_v18 = vpop.permute.xlu1 %371 }
 0x16d   :  { %v453_v20 = vmax.f32 %v449_v16, 0.0  ;;  %v411_v21 = vsel %vm410_vm5, %v406_v15, -inf  ;;  %v381_v33 = vadd.f32 %v372_v18, %v809_v49  ;;  %v469_v49 = vsel %vm459_vm7, %v456_v37, -inf  ;;  %v645_v37 = vld [vmem:[#allocation7 + $0x2] ss:$0 sm:$0xff] }
 0x16e   :  { %v485_v23 = vpop.permute.xlu0 %484  ;;  %v414_v24 = vmax.f32 %v411_v21, %v413_v19 }
 0x16f   :  { %v458_v25 = vsel %vm457_vm6, %v453_v20, -inf  ;;  %v496_v41 = vadd.f32 %v485_v23, %v449_v16 }
 0x170   :  { %v461_v29 = vmax.f32 %v458_v25, %v460_v27  ;;  %v415_v30 = vrot.slane %v414_v24, 4 }
 0x171   :  { %v500_v53 = vmax.f32 %v496_v41, 0.0 }
 0x172   :  { %v462_v34 = vrot.slane %v461_v29, 4  ;;  %v416_v39 = vmax.f32 %v414_v24, %v415_v30 }
 0x173   :  { %v505_v2 = vsel %vm504_vm8, %v500_v53, -inf }
 0x174   :  { %v442_v31 = vpop.permute.xlu1 %441  ;;  %v463_v40 = vmax.f32 %v461_v29, %v462_v34  ;;  %v417_v48 = vrot.slane %v416_v39, 2 }
 0x176   :  { %v395_v36 = vpop.permute.xlu0 %394  ;;  %v464_v56 = vrot.slane %v463_v40, 2  ;;  %v418_v63 = vmax.f32 %v416_v39, %v417_v48  ;;  %v644_v39 = vld [vmem:[#allocation7 + $0x3] ss:$0 sm:$0xff] }
 0x177   :  { %v404_v38 = vadd.f32 %v395_v36, %v381_v33 }
 0x178   :  { %v465_v5 = vmax.f32 %v463_v40, %v464_v56  ;;  %v419_v11 = vrot.slane %v418_v63, 1  ;;  %v646_v40 = vld [vmem:[#allocation7 + $0x1] ss:$0 sm:$0xff] }
 0x179   :  { %v408_v42 = vmax.f32 %v404_v38, 0.0  ;;  %v451_v43 = vadd.f32 %v442_v31, %v404_v38 }
 0x17a   :  { %v466_v16 = vrot.slane %v465_v5, 1  ;;  %v420_v21 = vmax.f32 %v418_v63, %v419_v11 }
 0x17b   :  { %v455_v46 = vmax.f32 %v451_v43, 0.0  ;;  %v498_v47 = vadd.f32 %v489_v44, %v451_v43  ;;  %v421_v50 = vsel %vm410_vm5, %v408_v42, -inf }
 0x17c   :  { %v487_v51 = vpop.permute.xlu1 %486  ;;  %v423_v52 = vmax.f32 %v421_v50, %v422_v45  ;;  %v467_v26 = vmax.f32 %v465_v5, %v466_v16 }
 0x17d   :  { %v468_v54 = vsel %vm457_vm6, %v455_v46, -inf  ;;  %v497_v55 = vadd.f32 %v487_v51, %v450_v12  ;;  %v502_v60 = vmax.f32 %v498_v47, 0.0 }
 0x17e   :  { %v470_v57 = vmax.f32 %v468_v54, %v469_v49  ;;  %v491_v58 = vpop.permute.xlu0 %490  ;;  %v424_v59 = vrot.slane %v423_v52, 4  ;;  %v647_v49 = vld [vmem:[#allocation7 + $0x4] ss:$0 sm:$0xff] }
 0x17f   :  { %v501_v61 = vmax.f32 %v497_v55, 0.0  ;;  %v499_v62 = vadd.f32 %v491_v58, %v452_v32  ;;  %v515_v9 = vsel %vm504_vm8, %v502_v60, -inf  ;;  %v648_v58 = vld [vmem:[#allocation7 + $0x5] ss:$0 sm:$0xff] }
 0x180   :  { %v471_v0 = vrot.slane %v470_v57, 4  ;;  %v425_v1 = vmax.f32 %v423_v52, %v424_v59 }
 0x181   :  { %v507_v3 = vsel %vm506_vm9, %v501_v61, -inf  ;;  %v503_v4 = vmax.f32 %v499_v62, 0.0 }
 0x182   :  { %v508_v6 = vmax.f32 %v505_v2, %v507_v3  ;;  %v472_v7 = vmax.f32 %v470_v57, %v471_v0  ;;  %v426_v8 = vrot.slane %v425_v1, 2 }
 0x183   :  { %v516_v10 = vsel %vm506_vm9, %v503_v4, -inf }
 0x184   :  { %v509_v12 = vrot.slane %v508_v6, 4  ;;  %v517_v13 = vmax.f32 %v515_v9, %v516_v10  ;;  %v473_v14 = vrot.slane %v472_v7, 2  ;;  %v427_v15 = vmax.f32 %v425_v1, %v426_v8 }
 0x186   :  { %v510_v17 = vmax.f32 %v508_v6, %v509_v12  ;;  %v518_v18 = vrot.slane %v517_v13, 4  ;;  %v474_v19 = vmax.f32 %v472_v7, %v473_v14  ;;  %v428_v20 = vrot.slane %v427_v15, 1 }
 0x188   :  { %v511_v22 = vrot.slane %v510_v17, 2  ;;  %v519_v23 = vmax.f32 %v517_v13, %v518_v18  ;;  %v475_v24 = vrot.slane %v474_v19, 1  ;;  %v429_v25 = vmax.f32 %v427_v15, %v428_v20 }
 0x18a   :  { %v512_v27 = vmax.f32 %v510_v17, %v511_v22  ;;  %v520_v28 = vrot.slane %v519_v23, 2  ;;  %v476_v29 = vmax.f32 %v474_v19, %v475_v24  ;;  %v527_v30 = vsel %vm526_vm10, %v429_v25, %v420_v21 }
 0x18c   :  { %v521_v31 = vmax.f32 %v519_v23, %v520_v28  ;;  %v531_v32 = vsel %vm526_vm10, %v476_v29, %v467_v26  ;;  %v513_v33 = vrot.slane %v512_v27, 1 }
 0x18d   :  { %532 = vrot.lane.b32.xlu1 %v531_v32, %s758_s0 }
 0x18e   :  { %v522_v34 = vrot.slane %v521_v31, 1  ;;  %v514_v35 = vmax.f32 %v512_v27, %v513_v33 }
 0x190   :  { %v523_v36 = vmax.f32 %v521_v31, %v522_v34 }
 0x192   :  { %v537_v38 = vsel %vm526_vm10, %v523_v36, %v514_v35 }
 0x193   :  { %538 = vrot.lane.b32.xlu2 %v537_v38, %s762_s5 }
 0x1ed   :  { %v539_v42 = vpop.permute.xlu2 %538 }
 0x1ff   :  { %v533_v41 = vpop.permute.xlu1 %532 }
 0x200   :  { %v541_v43 = vsel %vm410_vm5, %v527_v30, %v533_v41 }
 0x201   :  { %v543_v44 = vsel %vm542_vm11, %v541_v43, %v539_v42 }
 0x202   :  { %v559_v45 = vmul.f32 %v644_v39, %v543_v44  ;;  %v553_v46 = vmul.f32 %v645_v37, %v543_v44  ;;  %v546_v47 = vmul.f32 %v646_v40, %v543_v44  ;;  %v565_v52 = vmul.f32 %v647_v49, %v543_v44 }
 0x204   :  { %v560_v48 = vsel %vm547_vm12, %v559_v45, 0.0  ;;  %v554_v50 = vsel %vm547_vm12, %v553_v46, 0.0  ;;  %v548_v51 = vsel %vm547_vm12, %v546_v47, 0.0  ;;  %v566_v53 = vsel %vm547_vm12, %v565_v52, 0.0 }
 0x205   :  { %561 = vadd.xlane.f32.xlu2 %v560_v48  ;;  %555 = vadd.xlane.f32.xlu1 %v554_v50 }
 0x206   :  { %549 = vadd.xlane.f32.xlu0 %v548_v51 }
 0x20d   :  { %567 = vadd.xlane.f32.xlu2 %v566_v53 }
 0x278   :  { %v562_v54 = vpop.xlane.xlu2 %561  ;;  %v556_v55 = vpop.xlane.xlu1 %555 }
 0x279   :  { %v550_v56 = vpop.xlane.xlu0 %549 }
 0x27a   :  { %v571_v57 = vsel %vm570_vm13, %v550_v56, %v556_v55 }
 0x27b   :  { %v573_v60 = vsel %vm572_vm14, %v571_v57, %v562_v54 }
 0x280   :  { %v568_v59 = vpop.xlane.xlu2 %567 }
 0x281   :  { %v575_v61 = vsel %vm574_vm15, %v573_v60, %v568_v59 }
 0x282   :  { %v577_v62 = vadd.f32 %v648_v58, %v575_v61 }
 0x284   :  { %579 = vst.msk [vmem:[#allocation8] sm:$0x3] %vm578_vm0, %v577_v62 }
 0x285   :  { %590 = dma.vmem_to_hbm [thread:$0]  %s586_s7, 32, %s588_s10, [#allocation4]  }
 0x286   :  { %749 = dma.done.wait [#allocation4], 32  }
 0x287   :  { %750 = vsyncadd [#allocation4], 4294967264 }
 0x288   :  { %595 = vsyncpa [#allocation3], 1 }
 0x289   :  { %596 = vsyncpa [#allocation6], 1 }
 0x28a   :  { %597 = vsyncpa [#allocation4], 1 }

</bundles_post_ra>
